<compile_context>
chip_gen: v7x
topology: tpu7x:2x2x1
jax: 0.10.0
libtpu: 0.0.40
codegen_flags: <defaults>
</compile_context>

<pallas_src>
import numpy as np
import jax
import jax.numpy as jnp
from jax.experimental import pallas as pl
from jax.experimental.pallas import tpu as pltpu


def _make_down_block_kernel(B, H, W, c_in, c_out):
    w_cout = W * c_out

    def kernel(x_ref, w1_ref, b1_ref, w2_ref, b2_ref, sel_ref, skip_ref, down_ref):
        # x_ref   : (B, H, W*Cin)          bf16  packed input  (lanes = (w, cin))
        # w1_ref  : (3*W*Cin,  W*Cout)     bf16  dy-stacked banded conv1 weight
        # b1_ref  : (1, W*Cout)            f32
        # w2_ref  : (3*W*Cout, W*Cout)     bf16  dy-stacked banded conv2 weight
        # b2_ref  : (1, W*Cout)            f32
        # sel_ref : (B*H//2, B*H)          f32   0/1 even-row selection (exact pool pick)
        # skip_ref: (B, H, W*Cout)         f32   DoubleConv output (lanes = (w, cout))
        # down_ref: (B, H//2, W*Cout)      f32   2x2 maxpool, odd cout-blocks redundant

        def conv3x3_relu(inp, w_ref, b_ref):
            # inp: (B, H, K) bf16.  Build the dy-stacked operand [x(y-1) | x(y) | x(y+1)]
            # (zero rows at image borders -> SAME padding in H); the dx taps and the
            # W-side zero padding live inside the banded weight.  One MXU matmul with
            # M = B*H, K = 3*K_in; f32 accumulation, bias + ReLU on the VPU.
            K = inp.shape[-1]
            zrow = jnp.zeros((B, 1, K), inp.dtype)
            up = jnp.concatenate([zrow, inp[:, :-1, :]], axis=1)   # x[y-1], 0 at y=0
            dn = jnp.concatenate([inp[:, 1:, :], zrow], axis=1)    # x[y+1], 0 at y=H-1
            xk = jnp.concatenate([up, inp, dn], axis=2)            # (B, H, 3K)
            acc = jnp.dot(xk.reshape(B * H, 3 * K), w_ref[...],
                          preferred_element_type=jnp.float32)      # (B*H, W*Cout)
            return jnp.maximum(acc + b_ref[...], 0.0)

        x = x_ref[...]                                             # (B, H, W*Cin) bf16
        r1 = conv3x3_relu(x, w1_ref, b1_ref)                       # (B*H, W*Cout) f32
        r1b = r1.reshape(B, H, w_cout).astype(jnp.bfloat16)
        r2 = conv3x3_relu(r1b, w2_ref, b2_ref)                     # (B*H, W*Cout) f32

        skip_ref[...] = r2.reshape(B, H, w_cout).astype(skip_ref.dtype)   # lane-dense

        # ---- 2x2 max-pool, entirely in registers (no read-back of skip_ref) ----
        # H direction: max(row y, row y+1), then pick even rows with an exact 0/1
        # selection matmul (avoids strided slicing; HIGHEST precision keeps the copy
        # exact).  Rows that straddle an image boundary are never selected.
        zrow = jnp.zeros((1, w_cout), jnp.float32)
        rows_max = jnp.maximum(r2, jnp.concatenate([r2[1:, :], zrow], axis=0))
        hp = jnp.dot(sel_ref[...], rows_max,
                     preferred_element_type=jnp.float32,
                     precision=jax.lax.Precision.HIGHEST)          # (B*H//2, W*Cout)
        # W direction: shift by one Cout block along lanes and max; even w-blocks hold
        # the pooled values (odd blocks redundant -> store stays full-lane dense).
        wshift = jnp.concatenate([hp[:, c_out:], hp[:, :c_out]], axis=1)
        down = jnp.maximum(hp, wshift)
        down_ref[...] = down.reshape(B, H // 2, w_cout).astype(down_ref.dtype)

    return kernel


def _stacked_banded_weight(w_hwio, W):
    """(3, 3, Ci, Co) HWIO -> (3*W*Ci, W*Co), dy-stacked along K.

    Per dy slab: B[xi*Ci+ci, xo*Co+co] = w[dy, dx, ci, co] if xi == xo + dx - 1 else 0,
    which folds the three dx taps and the width-wise 'SAME' zero padding into the band.
    """
    kh, kw, ci, co = w_hwio.shape
    xi = jnp.arange(W)
    xo = jnp.arange(W)
    dx = jnp.arange(kw)
    band = (xi[None, :, None] == xo[None, None, :] + dx[:, None, None] - 1)
    band = band.astype(jnp.float32)                                   # (kw, W, W): [dx, xi, xo]
    wb = jnp.einsum("dab,kdio->kaibo", band, w_hwio.astype(jnp.float32))  # (kh, W, Ci, W, Co)
    return wb.reshape(kh * W * ci, W * co)


def _even_row_selection(B, H):
    """(B*H//2, B*H) 0/1 matrix picking rows b*H + 2*h2 (per-image even rows)."""
    rows = np.arange(B * (H // 2))
    cols = (rows // (H // 2)) * H + (rows % (H // 2)) * 2
    sel = np.zeros((B * (H // 2), B * H), np.float32)
    sel[rows, cols] = 1.0
    return jnp.asarray(sel)


def down_block_packed(x_p, w1, b1, w2, b2):
    """DownBlock on packed (N, H, W*Cin) bf16 input.

    Returns (down_p, skip_p) in packed layout:
      skip_p: (N, H,    W*Cout) f32, lanes = (w, cout)
      down_p: (N, H//2, W*Cout) f32, valid values in even w-blocks (odd blocks redundant)
    Chained DownBlocks should consume skip_p/down_p directly (no unpack needed).
    """
    N, H, w_cin = x_p.shape
    c_in = w1.shape[2]
    c_out = w1.shape[3]
    W = w_cin // c_in
    assert H % 2 == 0 and W % 2 == 0
    w_cout = W * c_out

    # Grid policy: keep >= 2 "parallel" grid steps when N allows (v7x: 2 TensorCores),
    # and fold the rest of the batch onto the matmul M axis (M = B_blk * H).
    num_steps = 2 if N >= 2 else 1
    B_blk = -(-N // num_steps)            # ceil div
    N_pad = num_steps * B_blk
    if N_pad != N:
        x_p = jnp.concatenate(
            [x_p, jnp.zeros((N_pad - N, H, w_cin), x_p.dtype)], axis=0)

    w1b = _stacked_banded_weight(w1, W).astype(jnp.bfloat16)   # (3*W*Cin,  W*Cout)
    w2b = _stacked_banded_weight(w2, W).astype(jnp.bfloat16)   # (3*W*Cout, W*Cout)
    b1p = jnp.tile(b1.astype(jnp.float32), W)[None, :]          # (1, W*Cout)
    b2p = jnp.tile(b2.astype(jnp.float32), W)[None, :]          # (1, W*Cout)
    sel = _even_row_selection(B_blk, H)                         # (B*H//2, B*H)

    kernel = _make_down_block_kernel(B_blk, H, W, c_in, c_out)
    skip_p, down_p = pl.pallas_call(
        kernel,
        out_shape=(
            jax.ShapeDtypeStruct((N_pad, H, w_cout), jnp.float32),
            jax.ShapeDtypeStruct((N_pad, H // 2, w_cout), jnp.float32),
        ),
        grid_spec=pltpu.PrefetchScalarGridSpec(
            num_scalar_prefetch=0,
            grid=(num_steps,),
            in_specs=[
                pl.BlockSpec((B_blk, H, w_cin), lambda n: (n, 0, 0)),
                pl.BlockSpec((3 * w_cin, w_cout), lambda n: (0, 0)),
                pl.BlockSpec((1, w_cout), lambda n: (0, 0)),
                pl.BlockSpec((3 * w_cout, w_cout), lambda n: (0, 0)),
                pl.BlockSpec((1, w_cout), lambda n: (0, 0)),
                pl.BlockSpec((B_blk * (H // 2), B_blk * H), lambda n: (0, 0)),
            ],
            out_specs=[
                pl.BlockSpec((B_blk, H, w_cout), lambda n: (n, 0, 0)),
                pl.BlockSpec((B_blk, H // 2, w_cout), lambda n: (n, 0, 0)),
            ],
        ),
        compiler_params=pltpu.CompilerParams(
            dimension_semantics=("parallel",)),
    )(x_p, w1b, b1p, w2b, b2p, sel)

    return down_p[:N], skip_p[:N]


def down_block(x_nchw, w1, b1, w2, b2):
    """Forward of DownBlock. x is NCHW, weights HWIO. Returns (down_out, skip_out), NCHW."""
    N, c_in, H, W = x_nchw.shape
    c_out = w1.shape[3]
    # Pack NCHW -> (N, H, W*C): W and C merged onto the lane axis; bf16 MXU operands.
    x_p = jnp.transpose(x_nchw, (0, 2, 3, 1)).reshape(N, H, W * c_in).astype(jnp.bfloat16)
    down_p, skip_p = down_block_packed(x_p, w1, b1, w2, b2)

    # Unpack only at the model boundary (kept out of the hot path for chained blocks).
    skip = jnp.transpose(skip_p.reshape(N, H, W, c_out), (0, 3, 1, 2))
    down = down_p.reshape(N, H // 2, W // 2, 2, c_out)[:, :, :, 0, :]
    down = jnp.transpose(down, (0, 3, 1, 2))
    return down, skip


def _reference(x_nchw, w1, b1, w2, b2, *, bf16_operands=False):
    """Pure-JAX reference. With bf16_operands=True it rounds conv operands to bf16
    (matching the kernel's MXU inputs) while accumulating in f32."""
    if bf16_operands:
        cast = lambda a: a.astype(jnp.bfloat16).astype(jnp.float32)
    else:
        cast = lambda a: a.astype(jnp.float32)
    dn = ("NHWC", "HWIO", "NHWC")
    prec = jax.lax.Precision.HIGHEST
    x = cast(jnp.transpose(x_nchw, (0, 2, 3, 1)))
    y = jax.lax.conv_general_dilated(x, cast(w1), (1, 1), "SAME",
                                     dimension_numbers=dn, precision=prec)
    y = jnp.maximum(y + b1.astype(jnp.float32), 0.0)
    y = jax.lax.conv_general_dilated(cast(y), cast(w2), (1, 1), "SAME",
                                     dimension_numbers=dn, precision=prec)
    skip = jnp.maximum(y + b2.astype(jnp.float32), 0.0)
    down = jax.lax.reduce_window(skip, -jnp.inf, jax.lax.max,
                                 (1, 2, 2, 1), (1, 2, 2, 1), "VALID")
    return (jnp.transpose(down, (0, 3, 1, 2)),
            jnp.transpose(skip, (0, 3, 1, 2)))


if __name__ == "__main__":
    key = jax.random.PRNGKey(0)
    N, C_in, C_out, H, W = 2, 4, 8, 16, 16

    kx, k1, kb1, k2, kb2 = jax.random.split(key, 5)
    x = jax.random.normal(kx, (N, C_in, H, W), jnp.float32)
    # deterministic synthetic parameters (HWIO layout)
    w1 = jax.random.normal(k1, (3, 3, C_in, C_out), jnp.float32) * 0.1
    b1 = jax.random.normal(kb1, (C_out,), jnp.float32) * 0.1
    w2 = jax.random.normal(k2, (3, 3, C_out, C_out), jnp.float32) * 0.1
    b2 = jax.random.normal(kb2, (C_out,), jnp.float32) * 0.1

    down_block_jit = jax.jit(down_block)
    down_out, skip_out = down_block_jit(x, w1, b1, w2, b2)
    jax.block_until_ready((down_out, skip_out))

    assert down_out.shape == (N, C_out, H // 2, W // 2)
    assert skip_out.shape == (N, C_out, H, W)

    # Tight check: reference using the same bf16-rounded operands (isolates kernel
    # logic from the intentional bf16 quantization of the MXU inputs).
    ref_down_q, ref_skip_q = _reference(x, w1, b1, w2, b2, bf16_operands=True)
    assert jnp.allclose(skip_out, ref_skip_q, atol=1e-2, rtol=1e-2)
    assert jnp.allclose(down_out, ref_down_q, atol=1e-2, rtol=1e-2)

    # Loose sanity check against the full-f32 reference (bounds the bf16 error).
    ref_down, ref_skip = _reference(x, w1, b1, w2, b2)
    assert jnp.allclose(skip_out, ref_skip, atol=1e-1, rtol=1e-1)
    assert jnp.allclose(down_out, ref_down, atol=1e-1, rtol=1e-1)

    print("KERNEL_OK")
</pallas_src>

<mosaic_0001>
module attributes {stable_mosaic.version = 11 : i64} {
  func.func @kernel(%arg0: i32, %arg1: memref<1x16x64xbf16, #tpu.memory_space<vmem>>, %arg2: memref<192x128xbf16, #tpu.memory_space<vmem>>, %arg3: memref<1x128xf32, #tpu.memory_space<vmem>>, %arg4: memref<384x128xbf16, #tpu.memory_space<vmem>>, %arg5: memref<1x128xf32, #tpu.memory_space<vmem>>, %arg6: memref<8x16xf32, #tpu.memory_space<vmem>>, %arg7: memref<1x16x128xf32, #tpu.memory_space<vmem>>, %arg8: memref<1x8x128xf32, #tpu.memory_space<vmem>>) attributes {dimension_semantics = [#tpu.dimension_semantics<parallel>], iteration_bounds = array<i64: 2>, scalar_prefetch = 0 : i64, scratch_operands = 0 : i64, tpu.core_type = #tpu.core_type<tc>, window_params = [{transform_indices = @transform_0, window_bounds = array<i64: 1, 16, 64>}, {pipeline_mode = #tpu.pipeline_mode<synchronous>, transform_indices = @transform_1, window_bounds = array<i64: 192, 128>}, {pipeline_mode = #tpu.pipeline_mode<synchronous>, transform_indices = @transform_2, window_bounds = array<i64: 1, 128>}, {pipeline_mode = #tpu.pipeline_mode<synchronous>, transform_indices = @transform_3, window_bounds = array<i64: 384, 128>}, {pipeline_mode = #tpu.pipeline_mode<synchronous>, transform_indices = @transform_4, window_bounds = array<i64: 1, 128>}, {pipeline_mode = #tpu.pipeline_mode<synchronous>, transform_indices = @transform_5, window_bounds = array<i64: 8, 16>}, {transform_indices = @transform_6, window_bounds = array<i64: 1, 16, 128>}, {transform_indices = @transform_7, window_bounds = array<i64: 1, 8, 128>}]} {
    %c0 = arith.constant 0 : index
    %c0_0 = arith.constant 0 : index
    %c0_1 = arith.constant 0 : index
    %0 = vector.load %arg1[%c0, %c0_0, %c0_1] : memref<1x16x64xbf16, #tpu.memory_space<vmem>>, vector<1x16x64xbf16>
    %cst = arith.constant 0.000000e+00 : bf16
    %1 = vector.broadcast %cst : bf16 to vector<1x1x64xbf16>
    %2 = vector.extract_strided_slice %0 {offsets = [0, 0, 0], sizes = [1, 15, 64], strides = [1, 1, 1]} : vector<1x16x64xbf16> to vector<1x15x64xbf16>
    %3 = tpu.concatenate %1, %2 in 1 : vector<1x1x64xbf16>, vector<1x15x64xbf16> -> vector<1x16x64xbf16>
    %4 = vector.extract_strided_slice %0 {offsets = [0, 1, 0], sizes = [1, 15, 64], strides = [1, 1, 1]} : vector<1x16x64xbf16> to vector<1x15x64xbf16>
    %5 = tpu.concatenate %4, %1 in 1 : vector<1x15x64xbf16>, vector<1x1x64xbf16> -> vector<1x16x64xbf16>
    %6 = tpu.concatenate %3, %0, %5 in 2 : vector<1x16x64xbf16>, vector<1x16x64xbf16>, vector<1x16x64xbf16> -> vector<1x16x192xbf16>
    %7 = vector.shape_cast %6 : vector<1x16x192xbf16> to vector<16x192xbf16>
    %c0_2 = arith.constant 0 : index
    %c0_3 = arith.constant 0 : index
    %8 = vector.load %arg2[%c0_2, %c0_3] : memref<192x128xbf16, #tpu.memory_space<vmem>>, vector<192x128xbf16>
    %cst_4 = arith.constant dense<0.000000e+00> : vector<16x128xf32>
    %9 = tpu.matmul %7, %8, %cst_4 {dimension_numbers = #tpu.dot_dimension_numbers<[1], [0], [0], [1], [0, 0, 1, 1], [], []>} : vector<16x192xbf16>, vector<192x128xbf16>, vector<16x128xf32> -> vector<16x128xf32>
    %c0_5 = arith.constant 0 : index
    %c0_6 = arith.constant 0 : index
    %10 = vector.load %arg3[%c0_5, %c0_6] : memref<1x128xf32, #tpu.memory_space<vmem>>, vector<1x128xf32>
    %11 = vector.broadcast %10 : vector<1x128xf32> to vector<16x128xf32>
    %12 = arith.addf %9, %11 : vector<16x128xf32>
    %cst_7 = arith.constant 0.000000e+00 : f32
    %13 = vector.broadcast %cst_7 : f32 to vector<16x128xf32>
    %14 = arith.maximumf %12, %13 : vector<16x128xf32>
    %15 = vector.shape_cast %14 : vector<16x128xf32> to vector<1x16x128xf32>
    %16 = arith.truncf %15 : vector<1x16x128xf32> to vector<1x16x128xbf16>
    %cst_8 = arith.constant 0.000000e+00 : bf16
    %17 = vector.broadcast %cst_8 : bf16 to vector<1x1x128xbf16>
    %18 = vector.extract_strided_slice %16 {offsets = [0, 0, 0], sizes = [1, 15, 128], strides = [1, 1, 1]} : vector<1x16x128xbf16> to vector<1x15x128xbf16>
    %19 = tpu.concatenate %17, %18 in 1 : vector<1x1x128xbf16>, vector<1x15x128xbf16> -> vector<1x16x128xbf16>
    %20 = vector.extract_strided_slice %16 {offsets = [0, 1, 0], sizes = [1, 15, 128], strides = [1, 1, 1]} : vector<1x16x128xbf16> to vector<1x15x128xbf16>
    %21 = tpu.concatenate %20, %17 in 1 : vector<1x15x128xbf16>, vector<1x1x128xbf16> -> vector<1x16x128xbf16>
    %22 = tpu.concatenate %19, %16, %21 in 2 : vector<1x16x128xbf16>, vector<1x16x128xbf16>, vector<1x16x128xbf16> -> vector<1x16x384xbf16>
    %23 = vector.shape_cast %22 : vector<1x16x384xbf16> to vector<16x384xbf16>
    %c0_9 = arith.constant 0 : index
    %c0_10 = arith.constant 0 : index
    %24 = vector.load %arg4[%c0_9, %c0_10] : memref<384x128xbf16, #tpu.memory_space<vmem>>, vector<384x128xbf16>
    %cst_11 = arith.constant dense<0.000000e+00> : vector<16x128xf32>
    %25 = tpu.matmul %23, %24, %cst_11 {dimension_numbers = #tpu.dot_dimension_numbers<[1], [0], [0], [1], [0, 0, 1, 1], [], []>} : vector<16x384xbf16>, vector<384x128xbf16>, vector<16x128xf32> -> vector<16x128xf32>
    %c0_12 = arith.constant 0 : index
    %c0_13 = arith.constant 0 : index
    %26 = vector.load %arg5[%c0_12, %c0_13] : memref<1x128xf32, #tpu.memory_space<vmem>>, vector<1x128xf32>
    %27 = vector.broadcast %26 : vector<1x128xf32> to vector<16x128xf32>
    %28 = arith.addf %25, %27 : vector<16x128xf32>
    %cst_14 = arith.constant 0.000000e+00 : f32
    %29 = vector.broadcast %cst_14 : f32 to vector<16x128xf32>
    %30 = arith.maximumf %28, %29 : vector<16x128xf32>
    %31 = vector.shape_cast %30 : vector<16x128xf32> to vector<1x16x128xf32>
    %c0_15 = arith.constant 0 : index
    %c0_16 = arith.constant 0 : index
    %c0_17 = arith.constant 0 : index
    %32 = vector.load %arg7[%c0_15, %c0_16, %c0_17] : memref<1x16x128xf32, #tpu.memory_space<vmem>>, vector<1x16x128xf32>
    tpu.vector_store %arg7[%c0_15, %c0_16, %c0_17], %31 {strides = array<i32>} : memref<1x16x128xf32, #tpu.memory_space<vmem>>, vector<1x16x128xf32>,
    %cst_18 = arith.constant 0.000000e+00 : f32
    %33 = vector.broadcast %cst_18 : f32 to vector<1x128xf32>
    %34 = vector.extract_strided_slice %30 {offsets = [1, 0], sizes = [15, 128], strides = [1, 1]} : vector<16x128xf32> to vector<15x128xf32>
    %35 = tpu.concatenate %34, %33 in 0 : vector<15x128xf32>, vector<1x128xf32> -> vector<16x128xf32>
    %36 = arith.maximumf %30, %35 : vector<16x128xf32>
    %c0_19 = arith.constant 0 : index
    %c0_20 = arith.constant 0 : index
    %37 = vector.load %arg6[%c0_19, %c0_20] : memref<8x16xf32, #tpu.memory_space<vmem>>, vector<8x16xf32>
    %cst_21 = arith.constant dense<0.000000e+00> : vector<8x128xf32>
    %38 = tpu.matmul %37, %36, %cst_21 {dimension_numbers = #tpu.dot_dimension_numbers<[1], [0], [0], [1], [0, 0, 1, 1], [], []>, precision = #tpu.contract_precision<fp32>} : vector<8x16xf32>, vector<16x128xf32>, vector<8x128xf32> -> vector<8x128xf32>
    %39 = vector.extract_strided_slice %38 {offsets = [0, 8], sizes = [8, 120], strides = [1, 1]} : vector<8x128xf32> to vector<8x120xf32>
    %40 = vector.extract_strided_slice %38 {offsets = [0, 0], sizes = [8, 8], strides = [1, 1]} : vector<8x128xf32> to vector<8x8xf32>
    %41 = tpu.concatenate %39, %40 in 1 : vector<8x120xf32>, vector<8x8xf32> -> vector<8x128xf32>
    %42 = arith.maximumf %38, %41 : vector<8x128xf32>
    %43 = vector.shape_cast %42 : vector<8x128xf32> to vector<1x8x128xf32>
    %c0_22 = arith.constant 0 : index
    %c0_23 = arith.constant 0 : index
    %c0_24 = arith.constant 0 : index
    %44 = vector.load %arg8[%c0_22, %c0_23, %c0_24] : memref<1x8x128xf32, #tpu.memory_space<vmem>>, vector<1x8x128xf32>
    tpu.vector_store %arg8[%c0_22, %c0_23, %c0_24], %43 {strides = array<i32>} : memref<1x8x128xf32, #tpu.memory_space<vmem>>, vector<1x8x128xf32>,
    return
  }
  func.func @transform_0(%arg0: i32) -> (i32, i32, i32) {
    %c0_i32 = arith.constant 0 : i32
    %c0_i32_0 = arith.constant 0 : i32
    %c0_i32_1 = arith.constant 0 : i32
    return %arg0, %c0_i32, %c0_i32_0 : i32, i32, i32
  }
  func.func @transform_1(%arg0: i32) -> (i32, i32) {
    %c0_i32 = arith.constant 0 : i32
    %c0_i32_0 = arith.constant 0 : i32
    %c0_i32_1 = arith.constant 0 : i32
    return %c0_i32, %c0_i32_0 : i32, i32
  }
  func.func @transform_2(%arg0: i32) -> (i32, i32) {
    %c0_i32 = arith.constant 0 : i32
    %c0_i32_0 = arith.constant 0 : i32
    %c0_i32_1 = arith.constant 0 : i32
    return %c0_i32, %c0_i32_0 : i32, i32
  }
  func.func @transform_3(%arg0: i32) -> (i32, i32) {
    %c0_i32 = arith.constant 0 : i32
    %c0_i32_0 = arith.constant 0 : i32
    %c0_i32_1 = arith.constant 0 : i32
    return %c0_i32, %c0_i32_0 : i32, i32
  }
  func.func @transform_4(%arg0: i32) -> (i32, i32) {
    %c0_i32 = arith.constant 0 : i32
    %c0_i32_0 = arith.constant 0 : i32
    %c0_i32_1 = arith.constant 0 : i32
    return %c0_i32, %c0_i32_0 : i32, i32
  }
  func.func @transform_5(%arg0: i32) -> (i32, i32) {
    %c0_i32 = arith.constant 0 : i32
    %c0_i32_0 = arith.constant 0 : i32
    %c0_i32_1 = arith.constant 0 : i32
    return %c0_i32, %c0_i32_0 : i32, i32
  }
  func.func @transform_6(%arg0: i32) -> (i32, i32, i32) {
    %c0_i32 = arith.constant 0 : i32
    %c0_i32_0 = arith.constant 0 : i32
    %c0_i32_1 = arith.constant 0 : i32
    return %arg0, %c0_i32, %c0_i32_0 : i32, i32, i32
  }
  func.func @transform_7(%arg0: i32) -> (i32, i32, i32) {
    %c0_i32 = arith.constant 0 : i32
    %c0_i32_0 = arith.constant 0 : i32
    %c0_i32_1 = arith.constant 0 : i32
    return %arg0, %c0_i32, %c0_i32_0 : i32, i32, i32
  }
}

</mosaic_0001>

<bundles_post_ra>
// kernel: tile.13
= control target key start
LH: loop header
LB: loop body
LE: loop exit
PB: predicated region body
PF: predicated region fallthrough
CT: control target
= control target key end

     0   :  { %s28_s0 = inlined_call_operand.vmem [shape: f32[8], index: 0, kind: input, shape index: {}]   ;;  %s29_s1 = inlined_call_operand.vmem [shape: f32[16,8], index: 1, kind: output, shape index: {}]  }
   0x1   :  { %v4_v0 = vld [vmem:[%s28_s0] ss:$0 sm:$0xff] }
   0x2   :  { %5 = vst [vmem:[%s29_s1] sm:$0xff] %v4_v0  ;;  %8 = vst [vmem:[%s29_s1 + $0x8] sm:$0xff] %v4_v0 }

// kernel: tile.14
= control target key start
LH: loop header
LB: loop body
LE: loop exit
PB: predicated region body
PF: predicated region fallthrough
CT: control target
= control target key end

     0   :  { %s131_s10 = smov 120   ;;  %s132_s11 = smov 104   ;;  %vm3_vm0 = vcmask 64512   ;;  %vm9_vm1 = vcmask 1048512   ;;  %vm15_vm2 = vcmask 982912   ;;  %vm21_vm3 = vcmask 917312   ;;  %s207_s0 = inlined_call_operand.vmem [shape: f32[16,8], index: 0, kind: input, shape index: {}]   ;;  %s208_s1 = inlined_call_operand.vmem [shape: f32[1,128], index: 1, kind: output, shape index: {}]  }
   0x1   :  { %v101_v0 = vld [vmem:[%s207_s0 + $0xf] sm:$0x1]   ;;  %v103_v1 = vld [vmem:[%s207_s0 + $0xd] sm:$0x1]   ;;  %v102_v2 = vld [vmem:[%s207_s0 + $0xe] sm:$0x1]  }
   0x2   :  { %7 = vrot.lane.b32.xlu0 %v101_v0, %s131_s10  ;;  %19 = vrot.lane.b32.xlu1 %v103_v1, %s132_s11  ;;  %v104_v3 = vld [vmem:[%s207_s0 + $0xc] sm:$0x1]   ;;  %s133_s16 = smov 112   ;;  %s134_s17 = smov 96   ;;  %v105_v4 = vld [vmem:[%s207_s0 + $0xb] sm:$0x1]  }
   0x3   :  { %v106_v5 = vld [vmem:[%s207_s0 + $0xa] sm:$0x1]   ;;  %v2_v6 = vld [vmem:[%s207_s0] sm:$0x1]   ;;  %s135_s24 = smov 88   ;;  %s136_s25 = smov 80  }
   0x4   :  { %4 = vst.msk [vmem:[#allocation0] sm:$0x1] %vm3_vm0, %v2_v6   ;;  %v107_v7 = vld [vmem:[%s207_s0 + $0x9] sm:$0x1]   ;;  %v108_v8 = vld [vmem:[%s207_s0 + $0x8] sm:$0x1]  }
   0x5   :  { %s137_s30 = smov 72   ;;  %s138_s2 = smov 64   ;;  %v109_v9 = vld [vmem:[%s207_s0 + $0x7] sm:$0x1]   ;;  %v110_v10 = vld [vmem:[%s207_s0 + $0x6] sm:$0x1]  }
   0x6   :  { %13 = vrot.lane.b32.xlu0 %v102_v2, %s133_s16  ;;  %25 = vrot.lane.b32.xlu1 %v104_v3, %s134_s17  ;;  %s139_s7 = smov 56   ;;  %s140_s8 = smov 48   ;;  %v111_v11 = vld [vmem:[%s207_s0 + $0x5] sm:$0x1]   ;;  %v112_v12 = vld [vmem:[%s207_s0 + $0x4] sm:$0x1]  }
   0x7   :  { %s141_s13 = smov 40   ;;  %s142_s14 = smov 32   ;;  %v113_v13 = vld [vmem:[%s207_s0 + $0x3] sm:$0x1]   ;;  %v114_v14 = vld [vmem:[%s207_s0 + $0x2] sm:$0x1]  }
   0x8   :  { %s143_s19 = smov 24   ;;  %s144_s20 = smov 16   ;;  %v115_v15 = vld [vmem:[%s207_s0 + $0x1] sm:$0x1]   ;;  %vm27_vm4 = vcmask 851712   ;;  %vm33_vm5 = vcmask 786112  }
   0x9   :  { %s145_s0 = smov 8   ;;  %vm39_vm6 = vcmask 720512   ;;  %vm45_vm7 = vcmask 654912   ;;  %vm51_vm8 = vcmask 589312   ;;  %vm57_vm9 = vcmask 523712  }
   0xa   :  { %31 = vrot.lane.b32.xlu0 %v105_v4, %s135_s24  ;;  %37 = vrot.lane.b32.xlu1 %v106_v5, %s136_s25  ;;  %vm63_vm10 = vcmask 458112   ;;  %vm69_vm11 = vcmask 392512   ;;  %vm75_vm12 = vcmask 326912   ;;  %vm81_vm13 = vcmask 261312  }
   0xb   :  { %vm87_vm14 = vcmask 195712   ;;  %vm93_vm15 = vcmask 130112  }
   0xe   :  { %43 = vrot.lane.b32.xlu0 %v107_v7, %s137_s30  ;;  %49 = vrot.lane.b32.xlu1 %v108_v8, %s138_s2 }
  0x12   :  { %55 = vrot.lane.b32.xlu0 %v109_v9, %s139_s7  ;;  %61 = vrot.lane.b32.xlu1 %v110_v10, %s140_s8 }
  0x16   :  { %67 = vrot.lane.b32.xlu0 %v111_v11, %s141_s13  ;;  %73 = vrot.lane.b32.xlu1 %v112_v12, %s142_s14 }
  0x1a   :  { %79 = vrot.lane.b32.xlu0 %v113_v13, %s143_s19  ;;  %85 = vrot.lane.b32.xlu1 %v114_v14, %s144_s20 }
  0x1e   :  { %91 = vrot.lane.b32.xlu0 %v115_v15, %s145_s0 }
  0x74   :  { %v8_v16 = vpop.permute.xlu0 %7   ;;  %v20_v17 = vpop.permute.xlu1 %19  }
  0x75   :  { %10 = vst.msk [vmem:[#allocation0] sm:$0x1] %vm9_vm1, %v8_v16  }
  0x78   :  { %v14_v18 = vpop.permute.xlu0 %13   ;;  %v26_v19 = vpop.permute.xlu1 %25  }
  0x79   :  { %16 = vst.msk [vmem:[#allocation0] sm:$0x1] %vm15_vm2, %v14_v18  }
  0x7a   :  { %22 = vst.msk [vmem:[#allocation0] sm:$0x1] %vm21_vm3, %v20_v17  }
  0x7b   :  { %28 = vst.msk [vmem:[#allocation0] sm:$0x1] %vm27_vm4, %v26_v19  }
  0x7c   :  { %v32_v20 = vpop.permute.xlu0 %31   ;;  %v38_v21 = vpop.permute.xlu1 %37  }
  0x7d   :  { %34 = vst.msk [vmem:[#allocation0] sm:$0x1] %vm33_vm5, %v32_v20  }
  0x7e   :  { %40 = vst.msk [vmem:[#allocation0] sm:$0x1] %vm39_vm6, %v38_v21  }
  0x80   :  { %v44_v22 = vpop.permute.xlu0 %43   ;;  %v50_v23 = vpop.permute.xlu1 %49  }
  0x81   :  { %46 = vst.msk [vmem:[#allocation0] sm:$0x1] %vm45_vm7, %v44_v22  }
  0x82   :  { %52 = vst.msk [vmem:[#allocation0] sm:$0x1] %vm51_vm8, %v50_v23  }
  0x84   :  { %v56_v24 = vpop.permute.xlu0 %55   ;;  %v62_v25 = vpop.permute.xlu1 %61  }
  0x85   :  { %58 = vst.msk [vmem:[#allocation0] sm:$0x1] %vm57_vm9, %v56_v24  }
  0x86   :  { %64 = vst.msk [vmem:[#allocation0] sm:$0x1] %vm63_vm10, %v62_v25  }
  0x88   :  { %v68_v26 = vpop.permute.xlu0 %67   ;;  %v74_v27 = vpop.permute.xlu1 %73  }
  0x89   :  { %70 = vst.msk [vmem:[#allocation0] sm:$0x1] %vm69_vm11, %v68_v26  }
  0x8a   :  { %76 = vst.msk [vmem:[#allocation0] sm:$0x1] %vm75_vm12, %v74_v27  }
  0x8c   :  { %v80_v28 = vpop.permute.xlu0 %79   ;;  %v86_v29 = vpop.permute.xlu1 %85  }
  0x8d   :  { %82 = vst.msk [vmem:[#allocation0] sm:$0x1] %vm81_vm13, %v80_v28  }
  0x8e   :  { %88 = vst.msk [vmem:[#allocation0] sm:$0x1] %vm87_vm14, %v86_v29  }
  0x90   :  { %v92_v30 = vpop.permute.xlu0 %91  }
  0x91   :  { %94 = vst.msk [vmem:[#allocation0] sm:$0x1] %vm93_vm15, %v92_v30  }
  0x98   :  { %v98_v31 = vld [vmem:[#allocation0] sm:$0x1] }
  0x99   :  { %100 = vst [vmem:[%s208_s1] sm:$0x1] %v98_v31 }

// kernel: down_block.1
= control target key start
LH: loop header
LB: loop body
LE: loop exit
PB: predicated region body
PF: predicated region fallthrough
CT: control target
= control target key end

     0   :  { %s1636_s24 = smov 0   ;;  %s1839_s0 = inlined_call_operand.vmem [shape: bf16[2,16,64], index: 0, kind: input, shape index: {}]   ;;  %s1840_s1 = inlined_call_operand.vmem [shape: bf16[192,128], index: 1, kind: input, shape index: {}]   ;;  %s1841_s2 = inlined_call_operand.vmem [shape: f32[1,128], index: 2, kind: input, shape index: {}]   ;;  %s1842_s3 = inlined_call_operand.vmem [shape: bf16[384,128], index: 3, kind: input, shape index: {}]   ;;  %s1843_s4 = inlined_call_operand.vmem [shape: f32[1,128], index: 4, kind: input, shape index: {}]   ;;  %s1844_s5 = inlined_call_operand.vmem [shape: f32[8,16], index: 5, kind: input, shape index: {}]   ;;  %s1845_s6 = inlined_call_operand.vmem [shape: f32[2,16,128], index: 6, kind: output, shape index: {0}]   ;;  %s1846_s7 = inlined_call_operand.vmem [shape: f32[2,8,128], index: 7, kind: output, shape index: {1}]  }
   0x1 LB: > { %s1339_s25 = sadd.s32 4294967295, %s1588_s24   ;;  %p1343_p0 = scmp.ge.s32.totalorder %s1588_s24, 1  ;;  %s1588_s24 = sphi %s1636_s24, %s18_s24  }
   0x2   : > { %p240_p1 = scmp.lt.s32.totalorder %s1588_s24, 3 }
   0x4   : > { %p241_p2 = pnand %p1343_p0, %p240_p1 }
   0x5   : > { %p276_p3 = scmp.lt.s32.totalorder (!%p241_p2), %s1339_s25, 1  ;;  %v1546_v0 = vld [vmem:[%s1840_s1] sm:$0xff] (!%p241_p2)   ;;  %v1590_v1 = vmov (!%p241_p2), 0   ;;  %v1547_v2 = vld [vmem:[%s1840_s1 + $0x8] sm:$0xff] (!%p241_p2)   ;;  %v1548_v3 = vld [vmem:[%s1840_s1 + $0x10] sm:$0xff] (!%p241_p2)   ;;  %s1591_s13 = smov (!%p241_p2), 64  }
   0x6   : > { %244 = sbr.rel (%p241_p2) target bundleno = 994 (0x3e2), region = 44  ;;  %430 = vmatprep.subr.bf16.mxu0 (!%p241_p2), %v1590_v1  ;;  %v1549_v7 = vld [vmem:[%s1840_s1 + $0x18] sm:$0xff] (!%p241_p2)   ;;  %vm313_vm0 = vcmask (!%p241_p2), 1047552   ;;  %v1550_v11 = vld [vmem:[%s1840_s1 + $0x20] sm:$0xff] (!%p241_p2)   ;;  %vm314_vm1 = vsmask.f32 (!%p241_p2), 7424 }
   0x7   : > { %431 = vmatpush1.bf16.msra.mxu0 (!%p241_p2), %v1546_v0  ;;  %vm319_vm2 = vcmask (!%p241_p2), 523264   ;;  %v1558_v13 = vld [vmem:[%s1842_s3 + $0x40] sm:$0xff] (!%p241_p2)   ;;  %vm1674_vm3 = vmand (!%p241_p2), %vm313_vm0, %vm314_vm1  ;;  %v1551_v16 = vld [vmem:[%s1840_s1 + $0x28] sm:$0xff] (!%p241_p2)   ;;  %vm306_vm4 = vcmask (!%p241_p2), 1040384   ;;  %vm307_vm5 = vsmask.f32 (!%p241_p2), 256 }
   0x8   : > { %432 = vmatprep.subr.bf16.mxu0 (!%p241_p2), %v1590_v1  ;;  %1393 = vmatprep.subr.bf16.mxu1 (!%p241_p2), %v1558_v13  ;;  %v1559_v17 = vld [vmem:[%s1842_s3] sm:$0xff] (!%p241_p2)   ;;  %v1560_v18 = vld [vmem:[%s1842_s3 + $0x48] sm:$0xff] (!%p241_p2)   ;;  %v1562_v20 = vld [vmem:[%s1842_s3 + $0x50] sm:$0xff] (!%p241_p2)   ;;  %v1592_v42 = vmov (!%p241_p2), 0.0   ;;  %vm1593_vm7 = vmmov (!%p241_p2), 0   ;;  %vm784_vm8 = vcmask (!%p241_p2), 130048  }
   0x9   : > { %1394 = vmatpush3.bf16.msra.mxu1 (!%p241_p2), %v1559_v17  ;;  %v1561_v19 = vld [vmem:[%s1842_s3 + $0x8] sm:$0xff] (!%p241_p2)   ;;  %v1552_v21 = vld [vmem:[%s1840_s1 + $0x30] sm:$0xff] (!%p241_p2)   ;;  %v1564_v23 = vld [vmem:[%s1842_s3 + $0x58] sm:$0xff] (!%p241_p2)   ;;  %vm774_vm9 = vcmask (!%p241_p2), 1046528  }
   0xa   : > { %1395 = vmatprep.subr.bf16.mxu1 (!%p241_p2), %v1560_v18  ;;  %v1563_v22 = vld [vmem:[%s1842_s3 + $0x10] sm:$0xff] (!%p241_p2)   ;;  %v1553_v24 = vld [vmem:[%s1840_s1 + $0x38] sm:$0xff] (!%p241_p2)   ;;  %v1566_v26 = vld [vmem:[%s1842_s3 + $0x60] sm:$0xff] (!%p241_p2)  }
   0xb   : > { %433 = vmatpush1.bf16.msra.mxu0 (!%p241_p2), %v1547_v2  ;;  %v1565_v25 = vld [vmem:[%s1842_s3 + $0x18] sm:$0xff] (!%p241_p2)   ;;  %v1554_v27 = vld [vmem:[%s1840_s1 + $0x40] sm:$0xff] (!%p241_p2)   ;;  %v1555_v28 = vld [vmem:[%s1840_s1 + $0x48] sm:$0xff] (!%p241_p2)  }
   0xc   : > { %434 = vmatprep.subr.bf16.mxu0 (!%p241_p2), %v1590_v1  ;;  %v1556_v29 = vld [vmem:[%s1840_s1 + $0x50] sm:$0xff] (!%p241_p2)   ;;  %v1557_v30 = vld [vmem:[%s1840_s1 + $0x58] sm:$0xff] (!%p241_p2)   ;;  %vm1734_vm6 = vmand (!%p241_p2), %vm306_vm4, %vm307_vm5 }
   0xd   : > { %s1852_s25 = smov (!%p276_p3, %s1339_s25), 1  ;;  %1396 = vmatpush3.bf16.msra.mxu1 %v1561_v19  ;;  %v1567_v35 = vld [vmem:[%s1842_s3 + $0x20] sm:$0xff]   ;;  %v1568_v36 = vld [vmem:[%s1842_s3 + $0x68] sm:$0xff]   ;;  %v1570_v38 = vld [vmem:[%s1842_s3 + $0x70] sm:$0xff]  }
   0xe   : > { %s1391_s30 = sshll.u32 %s1852_s25, 3  ;;  %1397 = vmatprep.subr.bf16.mxu1 %v1562_v20  ;;  %v1569_v37 = vld [vmem:[%s1842_s3 + $0x28] sm:$0xff]   ;;  %v1571_v39 = vld [vmem:[%s1842_s3 + $0x30] sm:$0xff]   ;;  %v1572_v40 = vld [vmem:[%s1842_s3 + $0x78] sm:$0xff]   ;;  %s1392_s26 = sshll.u32 %s1852_s25, 4 }
   0xf   : > { %s280_s10 = scalar_lea.vmem %s1839_s0, %s1391_s30  ;;  %435 = vmatpush1.bf16.msra.mxu0 %v1548_v3  ;;  %v1573_v41 = vld [vmem:[%s1842_s3 + $0x38] sm:$0xff]   ;;  %v1350_v43 = vld [vmem:[%s1841_s2] ss:$0 sm:$0xff]  ;;  %v1575_v59 = vld [vmem:[%s1842_s3 + $0x88] sm:$0xff]   ;;  %s285_s9 = scalar_lea.vmem %s1845_s6, %s1392_s26 }
  0x10   : > { %v1545_v4 = vld [vmem:[%s280_s10] sm:$0xff]   ;;  %436 = vmatprep.subr.bf16.mxu0 %v1590_v1  ;;  %v1576_v60 = vld [vmem:[%s1842_s3 + $0x90] sm:$0xff]   ;;  %v1577_v61 = vld [vmem:[%s1842_s3 + $0x98] sm:$0xff]   ;;  %s1595_s10 = smov 120  }
  0x11   : > { %317 = vrot.lane.b32.xlu0 %v1545_v4, %s1591_s13  ;;  %v299_v5 = vshrl.u32 %v1545_v4, 16  ;;  %v302_v6 = vshll.u32 %v1545_v4, 16  ;;  %1398 = vmatpush3.bf16.msra.mxu1 %v1563_v22  ;;  %v1574_v57 = vld [vmem:[%s1842_s3 + $0x80] sm:$0xff]   ;;  %v1579_v63 = vld [vmem:[%s1842_s3 + $0xa8] sm:$0xff]   ;;  %v1580_v0 = vld [vmem:[%s1842_s3 + $0xb0] sm:$0xff]   ;;  %s289_s13 = scalar_lea.vmem %s1846_s7, %s1391_s30 }
  0x12   : > { %1399 = vmatprep.subr.bf16.mxu1 %v1564_v23  ;;  %v1578_v62 = vld [vmem:[%s1842_s3 + $0xa0] sm:$0xff]   ;;  %v1581_v2 = vld [vmem:[%s1842_s3 + $0xb8] sm:$0xff]  }
  0x13   : > { %v301_v8 = vrot.slane %v299_v5, 7  ;;  %v310_v9 = vrot.slane %v302_v6, 1  ;;  %437 = vmatpush1.bf16.msra.mxu0 %v1549_v7  ;;  %v783_v14 = vld [vmem:[%s1844_s5] sm:$0xff] }
  0x14   : > { %438 = vmatprep.subr.bf16.mxu0 %v1590_v1  ;;  %v786_v20 = vsel %vm784_vm8, %v783_v14, 0 }
  0x15   : > { %v304_v10 = vor.u32 %v302_v6, %v301_v8  ;;  %v311_v12 = vor.u32 %v310_v9, %v299_v5  ;;  %1400 = vmatpush3.bf16.msra.mxu1 %v1565_v25  ;;  %v1594_v5 = vmov 0.0|0.0   ;;  %v855_v25 = vand.u32 4294901760, %v786_v20 }
  0x16   : > { %1401 = vmatprep.subr.bf16.mxu1 %v1566_v26 }
  0x17   : > { %v316_v15 = vsel %vm1674_vm3, %v311_v12, 0  ;;  %439 = vmatpush1.bf16.msra.mxu0 %v1550_v11  ;;  %v309_v32 = vsel %vm1734_vm6, 0, %v304_v10  ;;  %v1364_v12 = vld [vmem:[%s1843_s4] ss:$0 sm:$0xff] }
  0x18   : > { %1363 = vmatprep.mubr.msk.bf16.mxu0 %vm319_vm2, %v316_v15  ;;  %440 = vmatprep.subr.bf16.mxu0 %v1590_v1 }
  0x19   : > { %1402 = vmatpush3.bf16.msra.mxu1 %v1567_v35 }
  0x1a   : > { %1403 = vmatprep.subr.bf16.mxu1 %v1568_v36 }
  0x1b   : > { %441 = vmatpush1.bf16.msra.mxu0 %v1551_v16 }
  0x1c   : > { %442 = vmatprep.subr.bf16.mxu0 %v1590_v1 }
  0x1d   : > { %1404 = vmatpush3.bf16.msra.mxu1 %v1569_v37 }
  0x1e   : > { %1405 = vmatprep.subr.bf16.mxu1 %v1570_v38 }
  0x1f   : > { %443 = vmatpush1.bf16.msra.mxu0 %v1552_v21 }
  0x20   : > { %444 = vmatprep.subr.bf16.mxu0 %v1590_v1 }
  0x21   : > { %1406 = vmatpush3.bf16.msra.mxu1 %v1571_v39 }
  0x22   : > { %1407 = vmatprep.subr.bf16.mxu1 %v1572_v40 }
  0x23   : > { %445 = vmatpush1.bf16.msra.mxu0 %v1553_v24 }
  0x24   : > { %446 = vmatprep.subr.bf16.mxu0 %v1590_v1 }
  0x25   : > { %1408 = vmatpush3.bf16.msra.mxu1 %v1573_v41 }
  0x26   : > { %1442 = vmatprep.subr.bf16.mxu1 %v1592_v42 }
  0x27   : > { %447 = vmatpush1.bf16.msra.mxu0 %v1554_v27 }
  0x28   : > { %448 = vmatprep.subr.bf16.mxu0 %v1590_v1 }
  0x2b   : > { %449 = vmatpush1.bf16.msra.mxu0 %v1555_v28  ;;  %v856_v28 = vsub.f32 %v786_v20, %v855_v25 }
  0x2c   : > { %450 = vmatprep.subr.bf16.mxu0 %v1590_v1 }
  0x2d   : > { %v857_v31 = vand.u32 4294901760, %v856_v28 }
  0x2f   : > { %451 = vmatpush1.bf16.msra.mxu0 %v1556_v29 }
  0x30   : > { %452 = vmatprep.subr.bf16.mxu0 %v1590_v1 }
  0x33   : > { %453 = vmatpush1.bf16.msra.mxu0 %v1557_v30 }
  0x34   : > { %1507 = vmatprep.subr.bf16.mxu0 %v1594_v5 }
  0x83   : > { %v318_v33 = vpop.permute.xlu0 %317 }
  0x84   : > { %v322_v34 = vsel %vm319_vm2, %v309_v32, %v318_v33 }
  0x85   : > { %463 = vmatmul.mubr.bf16.vlgmr.msra.gmra.mrb[0].mxu0 %v322_v34  ;;  %v858_v34 = vsub.f32 %v856_v28, %v857_v31 }
  0x86   : > { %1473 = vmatprep.mubr.msk.f32.mxu0 %vm1593_vm7, %v1592_v42 }
  0x87   : > { %v859_v40 = vand.u32 4294901760, %v858_v34 }
 0x158   : > { %v464_v44 = vpop.f32.mrb[0].mxu0 }
 0x159   : > { %v465_v45 = vadd.f32 %v1350_v43, %v464_v44  ;;  %v466_v46 = vpop.f32.mrb[1].mxu0 }
 0x15a   : > { %v467_v47 = vpop.f32.mrb[2].mxu0 }
 0x15b   : > { %v468_v48 = vadd.f32 %v1350_v43, %v467_v47  ;;  %v469_v49 = vpop.f32.mrb[3].mxu0  ;;  %v471_v50 = vmax.f32 %v465_v45, 0.0 }
 0x15d   : > { %v472_v51 = vmax.f32 %v468_v48, 0.0 }
 0x15f   : > { %v473_v52 = vpack.c.bf16 %v472_v51, %v471_v50 }
 0x161   : > { %v475_v53 = vshrl.u32 %v473_v52, 16  ;;  %718 = vmatprep.mubr.bf16.mxu1 %v473_v52  ;;  %v478_v55 = vshll.u32 %v473_v52, 16 }
 0x163   : > { %v477_v54 = vrot.slane %v475_v53, 7  ;;  %v483_v1 = vrot.slane %v478_v55, 1 }
 0x165   : > { %v480_v56 = vor.u32 %v478_v55, %v477_v54  ;;  %v484_v3 = vor.u32 %v483_v1, %v475_v53 }
 0x167   : > { %v482_v58 = vsel %vm1734_vm6, 0, %v480_v56  ;;  %v486_v4 = vsel %vm1674_vm3, %v484_v3, 0 }
 0x168   : > { %719 = vmatmul.mubr.bf16.vlgmr.msra.gmra.mrb[0].mxu1 %v482_v58 }
 0x169   : > { %1443 = vmatpush3.bf16.msra.mxu1 %v1574_v57  ;;  %1458 = vmatprep.mubr.msk.bf16.mxu1 %vm1593_vm7, %v1592_v42 }
 0x16a   : > { %1444 = vmatprep.subr.bf16.mxu1 %v1592_v42 }
 0x16d   : > { %1445 = vmatpush3.bf16.msra.mxu1 %v1575_v59 }
 0x16e   : > { %1446 = vmatprep.subr.bf16.mxu1 %v1592_v42 }
 0x171   : > { %1447 = vmatpush3.bf16.msra.mxu1 %v1576_v60 }
 0x172   : > { %1448 = vmatprep.subr.bf16.mxu1 %v1592_v42 }
 0x175   : > { %1449 = vmatpush3.bf16.msra.mxu1 %v1577_v61 }
 0x176   : > { %1450 = vmatprep.subr.bf16.mxu1 %v1592_v42 }
 0x179   : > { %1451 = vmatpush3.bf16.msra.mxu1 %v1578_v62 }
 0x17a   : > { %1452 = vmatprep.subr.bf16.mxu1 %v1592_v42 }
 0x17d   : > { %1453 = vmatpush3.bf16.msra.mxu1 %v1579_v63 }
 0x17e   : > { %1454 = vmatprep.subr.bf16.mxu1 %v1592_v42 }
 0x181   : > { %1455 = vmatpush3.bf16.msra.mxu1 %v1580_v0 }
 0x182   : > { %1456 = vmatprep.subr.bf16.mxu1 %v1592_v42 }
 0x185   : > { %1457 = vmatpush3.bf16.msra.mxu1 %v1581_v2 }
 0x186   : > { %1504 = vmatprep.subr.bf16.mxu1 %v1594_v5 }
 0x188   : > { %1459 = vmatmul.mubr.bf16.vlgmr.msra.gmra.mrb[4].mxu1 %v486_v4 }
 0x189   : > { %1466 = vmatprep.mubr.msk.f32.mxu1 %vm1593_vm7, %v1592_v42 }
 0x23b   : > { %v1409_v6 = vpop.f32.mrb[0].mxu1 }
 0x23c   : > { %v1410_v7 = vpop.f32.mrb[1].mxu1 }
 0x23d   : > { %v1411_v8 = vadd.f32 %v1410_v7, %v1409_v6  ;;  %v1412_v9 = vpop.f32.mrb[2].mxu1 }
 0x23e   : > { %v1413_v10 = vpop.f32.mrb[3].mxu1 }
 0x23f   : > { %v1414_v11 = vadd.f32 %v1413_v10, %v1412_v9  ;;  %v721_v13 = vadd.f32 %v1411_v8, %v1364_v12 }
 0x241   : > { %v724_v18 = vadd.f32 %v1414_v11, %v1364_v12 }
 0x25b   : > { %v761_v15 = vpop.f32.mrb[4].mxu1 }
 0x25c   : > { %v762_v16 = vadd.f32 %v761_v15, %v721_v13  ;;  %v1460_v17 = vpop.f32.mrb[5].mxu1 }
 0x25d   : > { %v764_v19 = vpop.f32.mrb[6].mxu1 }
 0x25e   : > { %v768_v21 = vmax.f32 %v762_v16, 0.0  ;;  %v765_v22 = vadd.f32 %v764_v19, %v724_v18  ;;  %v1461_v23 = vpop.f32.mrb[7].mxu1 }
 0x260   : > { %770 = vst [vmem:[%s285_s9] sm:$0xff] %v768_v21  ;;  %v769_v24 = vmax.f32 %v765_v22, 0.0  ;;  %v775_v26 = vrot.slane %v768_v21, 1 }
 0x262   : > { %771 = vst [vmem:[%s285_s9 + $0x8] sm:$0xff] %v769_v24  ;;  %v776_v27 = vrot.slane %v769_v24, 1 }
 0x264   : > { %v777_v29 = vsel %vm774_vm9, %v775_v26, %v776_v27  ;;  %v780_v30 = vsel %vm774_vm9, %v776_v27, 0.0 }
 0x265   : > { %v781_v32 = vmax.f32 %v768_v21, %v777_v29  ;;  %v782_v33 = vmax.f32 %v769_v24, %v780_v30 }
 0x267   : > { %v792_v35 = vand.u32 4294901760, %v782_v33  ;;  %v789_v36 = vand.u32 4294901760, %v781_v32 }
 0x269   : > { %v874_v37 = vsub.f32 %v782_v33, %v792_v35  ;;  %v1505_v38 = vpack.c.bf16 %v792_v35, %v789_v36  ;;  %v867_v39 = vsub.f32 %v781_v32, %v789_v36 }
 0x26b   : > { %1506 = vmatpush3.bf16.msra.mxu1 %v1505_v38  ;;  %v868_v41 = vand.u32 4294901760, %v867_v39  ;;  %v875_v43 = vand.u32 4294901760, %v874_v37  ;;  %v1511_v44 = vpack.c.bf16 %v874_v37, %v867_v39 }
 0x26d   : > { %v869_v45 = vsub.f32 %v867_v39, %v868_v41  ;;  %v876_v46 = vsub.f32 %v874_v37, %v875_v43  ;;  %v1517_v47 = vpack.c.bf16 %v875_v43, %v868_v41 }
 0x26e   : > { %1467 = vmatmul.mubr.f32.vlgmr.msra.gmra.mrb[8].mxu1 %v859_v40 }
 0x26f   : > { %v870_v48 = vand.u32 4294901760, %v869_v45  ;;  %v877_v49 = vand.u32 4294901760, %v876_v46 }
 0x271   : > { %v1508_v50 = vpack.c.bf16 %v877_v49, %v870_v48 }
 0x273   : > { %1509 = vmatpush3.bf16.msra.mxu0 %v1508_v50 }
 0x274   : > { %1510 = vmatprep.subr.bf16.mxu0 %v1594_v5 }
 0x276   : > { %1474 = vmatmul.mubr.f32.vlgmr.msra.gmra.mrb[4].mxu0 %v855_v25 }
 0x277   : > { %1512 = vmatpush3.bf16.msra.mxu0 %v1511_v44  ;;  %1480 = vmatprep.mubr.msk.f32.mxu0 %vm1593_vm7, %v1592_v42 }
 0x278   : > { %1513 = vmatprep.subr.bf16.mxu0 %v1594_v5 }
 0x27e   : > { %1481 = vmatmul.mubr.f32.vlgmr.msra.gmra.mrb[4].mxu0 %v856_v28 }
 0x27f   : > { %1515 = vmatpush3.bf16.msra.mxu0 %v1505_v38  ;;  %1487 = vmatprep.mubr.msk.f32.mxu0 %vm1593_vm7, %v1592_v42 }
 0x280   : > { %1516 = vmatprep.subr.bf16.mxu0 %v1594_v5 }
 0x286   : > { %1488 = vmatmul.mubr.f32.vlgmr.msra.gmra.mrb[4].mxu0 %v857_v31 }
 0x287   : > { %1518 = vmatpush3.bf16.msra.mxu0 %v1517_v47  ;;  %1494 = vmatprep.mubr.msk.f32.mxu0 %vm1593_vm7, %v1592_v42 }
 0x288   : > { %1519 = vmatprep.subr.bf16.mxu0 %v1594_v5 }
 0x28e   : > { %1495 = vmatmul.mubr.f32.vlgmr.msra.gmra.mrb[4].mxu0 %v855_v25 }
 0x28f   : > { %1521 = vmatpush3.bf16.msra.mxu0 %v1505_v38  ;;  %1501 = vmatprep.mubr.msk.f32.mxu0 %vm1593_vm7, %v1592_v42 }
 0x296   : > { %1502 = vmatmul.mubr.f32.vlgmr.msra.gmra.mrb[4].mxu0 %v855_v25 }
 0x341   : > { %v861_v51 = vpop.f32.mrb[8].mxu1 }
 0x342   : > { %v1468_v52 = vpop.f32.mrb[9].mxu1 }
 0x369   : > { %v1243_v53 = vpop.f32.mrb[4].mxu0 }
 0x36a   : > { %v1522_v54 = vadd.f32 %v1243_v53, %v861_v51  ;;  %v1503_v55 = vpop.f32.mrb[5].mxu0 }
 0x36c   : > { %1248 = vrot.lane.b32.xlu0 %v1522_v54, %s1595_s10 }
 0x3de   : > { %v1249_v56 = vpop.permute.xlu0 %1248 }
 0x3df   : > { %v1251_v57 = vmax.f32 %v1522_v54, %v1249_v56 }
 0x3e1   : > { %1252 = vst [vmem:[%s289_s13] sm:$0xff] %v1251_v57 }
 0x3e2 PF: > { %s18_s24 = sadd.s32 1, %s1588_s24  }
 0x3e3   : > { %p15_p4 = scmp.ge.s32.totalorder %s18_s24, 4  }
 0x3e5   :  { %17 = sbr.rel (!%p15_p4) target bundleno = 1 (0x1), region = 86 }

</bundles_post_ra>
